<compile_context>
chip_gen: v7x
topology: tpu7x:2x2x1
jax: 0.10.0
libtpu: 0.0.40
codegen_flags: <defaults>
</compile_context>

<pallas_src>
import functools

import jax
import jax.numpy as jnp
from jax import lax
from jax.experimental import pallas as pl
from jax.experimental.pallas import tpu as pltpu

EPS = 1e-5
LANE = 128


def _round_up(x, m):
    return ((x + m - 1) // m) * m


def _pad_vec(v, cpad, one=False):
    return jnp.pad(v, (0, cpad - v.shape[0]), constant_values=1.0 if one else 0.0)


def _stack_w_1x3(w, cpi, cpo):
    """(cout, cin, 1, 3) torch layout -> (3*cpi, cpo) f32: the three width taps are
    stacked on the contraction axis so the 1x3 conv is a single MXU matmul."""
    cout, cin, _, k = w.shape
    taps = jnp.transpose(w[:, :, 0, :], (2, 1, 0))            # (3, cin, cout)
    taps = jnp.pad(taps, ((0, 0), (0, cpi - cin), (0, cpo - cout)))
    return taps.reshape(k * cpi, cpo).astype(jnp.float32)


def _tpu_vmem_capacity_bytes():
    """Physical VMEM per core (64 MiB on v7x, 128 MiB on v5e/v6e); safe fallback."""
    try:
        return int(pltpu.get_tpu_info().vmem_capacity_bytes)
    except Exception:
        return 128 * 1024 * 1024


# -----------------------------------------------------------------------------
# one-time probe of the pltpu.roll rotation convention (robust across versions)
# -----------------------------------------------------------------------------
_ROLL_SIGN = None  # +1: matches jnp.roll; -1: reversed; 0: unusable -> concat fallback


def _roll_sign():
    global _ROLL_SIGN
    if _ROLL_SIGN is not None:
        return _ROLL_SIGN
    try:
        def probe(x_ref, o_ref):
            o_ref[...] = pltpu.roll(x_ref[...], 1, 0)

        x = jnp.arange(8 * LANE, dtype=jnp.float32).reshape(8, LANE)
        y = pl.pallas_call(
            probe, out_shape=jax.ShapeDtypeStruct((8, LANE), jnp.float32))(x)
        if bool(jnp.array_equal(y, jnp.roll(x, 1, axis=0))):
            _ROLL_SIGN = 1
        elif bool(jnp.array_equal(y, jnp.roll(x, -1, axis=0))):
            _ROLL_SIGN = -1
        else:
            _ROLL_SIGN = 0
    except Exception:
        _ROLL_SIGN = 0
    return _ROLL_SIGN


# -----------------------------------------------------------------------------
# in-kernel helpers
# -----------------------------------------------------------------------------
def _w_index(rows, width):
    """Hoisted (rows, 1) within-image-row width index (w fastest in the rows)."""
    idx = lax.broadcasted_iota(jnp.int32, (rows, 1), 0)
    if width & (width - 1) == 0:
        return idx & (width - 1)
    return idx % width


def _neighbor(h, direction, edge_mask, roll_sign):
    """Width-neighbor of every row (h in f32).  direction=-1: value at w-1 (zero at
    w==0); +1: value at w+1 (zero at w==W-1).  edge_mask is hoisted (rows, 1)."""
    rows = h.shape[0]
    if roll_sign != 0:
        # XLU sublane rotate (free slot while MXU / vst are the binding units).
        # Wrapped rows only land on masked edge rows because every tile starts and
        # ends on an image-row boundary.
        shift = (-direction * roll_sign) % rows
        shifted = pltpu.roll(h, shift, 0)
    else:
        zero_row = jnp.zeros((1, h.shape[1]), h.dtype)
        if direction == -1:
            shifted = jnp.concatenate([zero_row, h[: rows - 1, :]], axis=0)
        else:
            shifted = jnp.concatenate([h[1:, :], zero_row], axis=0)
    return jnp.where(edge_mask, jnp.zeros_like(shifted), shifted)


def _write_stats(stats_ref, c):
    """Per-tile partial sums: row0 = sum, row1 = sum(x^2).  Rows 2..7 of the (8,C)
    block are never read by _scale_shift, so they are left untouched."""
    stats_ref[0:1, :] = jnp.sum(c, axis=0, keepdims=True)
    stats_ref[1:2, :] = jnp.sum(c * c, axis=0, keepdims=True)


# -----------------------------------------------------------------------------
# kernels
# -----------------------------------------------------------------------------
def _conv1x3_stats_kernel(*refs, width, apply_affine, compute_dtype, roll_sign):
    """[optional BN-affine + ReLU] -> 1x3 stride-1 conv (single matmul) + stats."""
    if apply_affine:
        x_ref, scale_ref, shift_ref, w_ref, out_ref, stats_ref = refs
        h = jnp.maximum(x_ref[...].astype(jnp.float32) * scale_ref[...]
                        + shift_ref[...], 0.0)
    else:
        x_ref, w_ref, out_ref, stats_ref = refs
        h = x_ref[...].astype(jnp.float32)
    rows = h.shape[0]
    w_idx = _w_index(rows, width)                         # hoisted boundary masks
    left = _neighbor(h, -1, w_idx == 0, roll_sign)
    right = _neighbor(h, +1, w_idx == width - 1, roll_sign)
    taps = jnp.concatenate([left, h, right], axis=1).astype(compute_dtype)
    c = jnp.dot(taps, w_ref[...], preferred_element_type=jnp.float32)
    out_ref[...] = c.astype(out_ref.dtype)
    _write_stats(stats_ref, c)


def _ds_fused_conv_stats_kernel(x2_ref, wf_ref, c1_ref, c3_ref, s1_ref, s3_ref,
                                *, wo, cin_p, cout_p, compute_dtype, roll_sign):
    """Downsample head: conv1 (1x3 stride-(1,2)) and conv3 (1x1 stride-(1,2)) fused
    into ONE MXU matmul: taps (rows, 3*Cpi) @ [w1 | w3-at-center-rows] (3*Cpi, 2*Cpo),
    result lane-split into c1 / c3.  Input tile is the (rows, 2*Cin) pairing
    [x(w=2*wo) | x(w=2*wo+1)] from a free reshape in the wrapper."""
    x2 = x2_ref[...].astype(jnp.float32)
    xc = x2[:, :cin_p]                                    # center taps (w = 2wo)
    xo = x2[:, cin_p:]                                    # right  taps (w = 2wo+1)
    rows = xc.shape[0]
    wo_idx = _w_index(rows, wo)
    xl = _neighbor(xo, -1, wo_idx == 0, roll_sign)        # left taps (w = 2wo-1)
    taps = jnp.concatenate([xl, xc, xo], axis=1).astype(compute_dtype)
    c = jnp.dot(taps, wf_ref[...], preferred_element_type=jnp.float32)  # (rows, 2*Cpo)
    c1 = c[:, :cout_p]
    c3 = c[:, cout_p:]
    c1_ref[...] = c1.astype(c1_ref.dtype)
    c3_ref[...] = c3.astype(c3_ref.dtype)
    _write_stats(s1_ref, c1)
    _write_stats(s3_ref, c3)


def _bn_add_relu_kernel(h2_ref, res_ref, scale2_ref, shift2_ref,
                        scale_r_ref, shift_r_ref, o_ref):
    """bn2(conv2_out) + bn3(residual)/identity -> ReLU (pure VPU, HBM-bound)."""
    h2 = h2_ref[...].astype(jnp.float32) * scale2_ref[...] + shift2_ref[...]
    res = res_ref[...].astype(jnp.float32) * scale_r_ref[...] + shift_r_ref[...]
    o_ref[...] = jnp.maximum(h2 + res, 0.0).astype(o_ref.dtype)


# -----------------------------------------------------------------------------
# tiny JAX glue: fold partial sums into per-channel BN scale / shift
# -----------------------------------------------------------------------------
def _scale_shift(stats, count, gamma, beta):
    s = stats.reshape(-1, 8, stats.shape[-1])
    total = jnp.sum(s[:, 0, :], axis=0)          # only rows 0/1 are ever read
    total_sq = jnp.sum(s[:, 1, :], axis=0)
    mean = total / count
    var = jnp.maximum(total_sq / count - mean * mean, 0.0)
    scale = gamma * lax.rsqrt(var + EPS)
    shift = beta - mean * scale
    return (scale.reshape(1, -1).astype(jnp.float32),
            shift.reshape(1, -1).astype(jnp.float32))


# -----------------------------------------------------------------------------
# VMEM model + tile selection
# -----------------------------------------------------------------------------
def _vmem_estimate(tnh, *, w_in, wout, cpi, cpo, itemsz, downsample, bufs=2):
    """Per-pallas_call VMEM footprint (worst of the three passes): pipelined
    activation buffers x `bufs`, resident weights x 2, f32 taps staging, stats."""
    rows_in = tnh * w_in
    rows_out = tnh * wout
    cmax = max(cpi, cpo)
    taps = rows_out * 3 * cmax * 4                          # f32 taps staging
    stats_blk = 8 * cpo * 4
    if downsample:
        a_act = (rows_out * 2 * cpi + 2 * rows_out * cpo) * itemsz + 2 * stats_blk
        a_w = 3 * cpi * (2 * cpo) * itemsz
    else:
        a_act = (rows_in * cpi + rows_out * cpo) * itemsz + stats_blk
        a_w = 3 * cpi * cpo * itemsz
    pass_a = bufs * a_act + 2 * a_w + taps
    pass_b = (bufs * (2 * rows_out * cpo * itemsz + stats_blk)
              + 2 * (3 * cpo * cpo * itemsz) + rows_out * 3 * cpo * 4)
    pass_c = bufs * 3 * rows_out * cpo * itemsz
    return max(pass_a, pass_b, pass_c)


def _pick_tnh(nh, wout, align, budget, est_fn):
    """Largest divisor of N*H whose modeled VMEM footprint fits `budget`, keeping
    blocks sublane-aligned and (when possible) >= 2 grid tiles so "parallel"
    semantics can shard across v7x's two TensorCores."""
    divs = [d for d in range(1, nh + 1) if nh % d == 0]
    legal = [d for d in divs if (d * wout) % align == 0]
    if not legal:
        return nh                    # full-array blocks are always a legal shape
    multi = [d for d in legal if nh // d >= 2]
    pool = multi if multi else legal
    fitting = [d for d in pool if est_fn(d) <= budget]
    return max(fitting) if fitting else min(pool)


def _act_spec(rows, cols, depth=2):
    """Row-tiled activation BlockSpec; optional >2-deep pipelining (guarded)."""
    if depth > 2 and hasattr(pl, "Buffered"):
        try:
            return pl.BlockSpec((rows, cols), lambda i: (i, 0),
                                pipeline_mode=pl.Buffered(depth))
        except TypeError:
            pass
    return pl.BlockSpec((rows, cols), lambda i: (i, 0))


# -----------------------------------------------------------------------------
# module wrapper
# -----------------------------------------------------------------------------
class ResidualBlockPallas:
    def __init__(self, in_channels, out_channels, downsample=False, key=None,
                 compute_dtype=jnp.bfloat16, max_tile_bytes=None, pipeline_depth=2):
        if not downsample and in_channels != out_channels:
            raise ValueError("identity residual requires in_channels == out_channels")
        self.cin = in_channels
        self.cout = out_channels
        self.downsample = downsample
        self.compute_dtype = compute_dtype
        self.max_tile_bytes = max_tile_bytes      # None -> generation-aware default
        self.pipeline_depth = pipeline_depth      # 3 on v5e/v6e is a worthwhile sweep
        key = jax.random.PRNGKey(42) if key is None else key
        k1, k2, k3 = jax.random.split(key, 3)
        s1 = 1.0 / jnp.sqrt(in_channels * 3.0)
        s2 = 1.0 / jnp.sqrt(out_channels * 3.0)
        p = {
            "w1": jax.random.normal(k1, (out_channels, in_channels, 1, 3), jnp.float32) * s1,
            "w2": jax.random.normal(k2, (out_channels, out_channels, 1, 3), jnp.float32) * s2,
            "g1": jnp.ones((out_channels,), jnp.float32),
            "b1": jnp.zeros((out_channels,), jnp.float32),
            "g2": jnp.ones((out_channels,), jnp.float32),
            "b2": jnp.zeros((out_channels,), jnp.float32),
        }
        if downsample:
            p["w3"] = jax.random.normal(k3, (out_channels, in_channels, 1, 1),
                                        jnp.float32) * (1.0 / jnp.sqrt(in_channels * 1.0))
            p["g3"] = jnp.ones((out_channels,), jnp.float32)
            p["b3"] = jnp.zeros((out_channels,), jnp.float32)
        self.params = p

    def __call__(self, x):
        p = self.params
        N, Cin, H, W = x.shape
        assert Cin == self.cin
        Cout = self.cout
        cd = self.compute_dtype
        itemsz = jnp.dtype(cd).itemsize
        Cpi = _round_up(Cin, LANE)
        Cpo = _round_up(Cout, LANE)
        NH = N * H
        roll_sign = _roll_sign()

        # NCHW -> lane-padded 2-D (N*H*W, Cpi): w fastest in rows, channels on lanes.
        # TODO(synk): for C << 128 the lane padding wastes >95% of HBM/MXU work;
        # fold width/batch into the lane axis if small-C blocks matter in production.
        x_rows = jnp.transpose(x, (0, 2, 3, 1)).astype(jnp.float32).reshape(NH * W, Cin)
        x2d = jnp.pad(x_rows, ((0, 0), (0, Cpi - Cin))).astype(cd)

        w1_2d = _stack_w_1x3(p["w1"], Cpi, Cpo)                 # f32 (3*Cpi, Cpo)
        w2_2d = _stack_w_1x3(p["w2"], Cpo, Cpo).astype(cd)
        g1p, b1p = _pad_vec(p["g1"], Cpo, one=True), _pad_vec(p["b1"], Cpo)
        g2p, b2p = _pad_vec(p["g2"], Cpo, one=True), _pad_vec(p["b2"], Cpo)

        if self.downsample:
            if W % 2 != 0:
                # TODO(synk): odd input widths in the downsample path need a per-row
                # tail gather; not implemented (test shapes use even W).
                raise NotImplementedError("downsample path assumes even W")
            Wout = W // 2
        else:
            Wout = W

        # -------- generation-aware VMEM budget, dtype-aware alignment ----------
        cap = _tpu_vmem_capacity_bytes()             # 64 MiB/TC on v7x, 128 MiB else
        budget = (self.max_tile_bytes if self.max_tile_bytes is not None
                  else min(48 << 20, int(cap * 0.38)))
        align = 16 if itemsz == 2 else 8             # bf16 vs f32 sublane packing
        bufs = max(2, self.pipeline_depth)
        est = functools.partial(_vmem_estimate, w_in=W, wout=Wout, cpi=Cpi, cpo=Cpo,
                                itemsz=itemsz, downsample=self.downsample, bufs=bufs)
        tnh = _pick_tnh(NH, Wout, align, budget, est)
        T = NH // tnh
        tr_out = tnh * Wout
        R_out = NH * Wout
        count = float(R_out)
        vmem_limit = int(min(cap * 0.65, max(32 << 20, est(tnh) * 1.3)))
        cparams = pltpu.CompilerParams(dimension_semantics=("parallel",),
                                       vmem_limit_bytes=vmem_limit)
        depth = self.pipeline_depth

        def const_spec(shape):                       # tiny operands stay VMEM-resident
            return pl.BlockSpec(shape, lambda i: (0, 0))

        stats_spec = pl.BlockSpec((8, Cpo), lambda i: (i, 0))
        stats_shape = jax.ShapeDtypeStruct((T * 8, Cpo), jnp.float32)

        # ---------------- pass A: conv1 (+ fused conv3 when downsampling) ------
        if not self.downsample:
            flops_a = 2 * NH * W * (3 * Cpi) * Cpo
            bytes_a = int((NH * W * Cpi + 3 * Cpi * Cpo + NH * W * Cpo) * itemsz
                          + T * 8 * Cpo * 4)
            c1_raw, stats1 = pl.pallas_call(
                functools.partial(_conv1x3_stats_kernel, width=W, apply_affine=False,
                                  compute_dtype=cd, roll_sign=roll_sign),
                grid=(T,),
                in_specs=[_act_spec(tnh * W, Cpi, depth),
                          const_spec((3 * Cpi, Cpo))],
                out_specs=(_act_spec(tnh * W, Cpo), stats_spec),
                out_shape=(jax.ShapeDtypeStruct((NH * W, Cpo), cd), stats_shape),
                compiler_params=cparams,
                cost_estimate=pl.CostEstimate(flops=int(flops_a), transcendentals=0,
                                              bytes_accessed=bytes_a),
            )(x2d, w1_2d.astype(cd))
            scale1, shift1 = _scale_shift(stats1, count, g1p, b1p)
            residual = x2d                                  # identity (Cin == Cout)
            scale_r = jnp.ones((1, Cpo), jnp.float32)
            shift_r = jnp.zeros((1, Cpo), jnp.float32)
        else:
            g3p, b3p = _pad_vec(p["g3"], Cpo, one=True), _pad_vec(p["b3"], Cpo)
            # w3 zero-padded onto the center-tap rows and fused with w1 on the
            # output axis -> one (rows, 3*Cpi) @ (3*Cpi, 2*Cpo) matmul.
            w3_block = jnp.zeros((3 * Cpi, Cpo), jnp.float32)
            w3_block = w3_block.at[Cpi:Cpi + Cin, :Cout].set(p["w3"][:, :, 0, 0].T)
            wf = jnp.concatenate([w1_2d, w3_block], axis=1).astype(cd)
            x_pairs = x2d.reshape(NH * Wout, 2 * Cpi)       # free reshape: (even|odd) w
            flops_a = 2 * R_out * (3 * Cpi) * (2 * Cpo)
            bytes_a = int((R_out * 2 * Cpi + 3 * Cpi * 2 * Cpo + 2 * R_out * Cpo) * itemsz
                          + 2 * T * 8 * Cpo * 4)
            c1_raw, c3_raw, stats1, stats3 = pl.pallas_call(
                functools.partial(_ds_fused_conv_stats_kernel, wo=Wout, cin_p=Cpi,
                                  cout_p=Cpo, compute_dtype=cd, roll_sign=roll_sign),
                grid=(T,),
                in_specs=[_act_spec(tr_out, 2 * Cpi, depth),
                          const_spec((3 * Cpi, 2 * Cpo))],
                out_specs=(_act_spec(tr_out, Cpo), _act_spec(tr_out, Cpo),
                           stats_spec, stats_spec),
                out_shape=(jax.ShapeDtypeStruct((R_out, Cpo), cd),
                           jax.ShapeDtypeStruct((R_out, Cpo), cd),
                           stats_shape, stats_shape),
                compiler_params=cparams,
                cost_estimate=pl.CostEstimate(flops=int(flops_a), transcendentals=0,
                                              bytes_accessed=bytes_a),
            )(x_pairs, wf)
            scale1, shift1 = _scale_shift(stats1, count, g1p, b1p)
            scale_r, shift_r = _scale_shift(stats3, count, g3p, b3p)
            residual = c3_raw

        # ---------------- pass B: bn1 + relu + conv2 + stats -------------------
        flops_b = 2 * R_out * (3 * Cpo) * Cpo
        bytes_b = int((2 * R_out * Cpo + 3 * Cpo * Cpo) * itemsz
                      + (2 * Cpo + T * 8 * Cpo) * 4)
        c2_raw, stats2 = pl.pallas_call(
            functools.partial(_conv1x3_stats_kernel, width=Wout, apply_affine=True,
                              compute_dtype=cd, roll_sign=roll_sign),
            grid=(T,),
            in_specs=[_act_spec(tr_out, Cpo),
                      const_spec((1, Cpo)), const_spec((1, Cpo)),
                      const_spec((3 * Cpo, Cpo))],
            out_specs=(_act_spec(tr_out, Cpo), stats_spec),
            out_shape=(jax.ShapeDtypeStruct((R_out, Cpo), cd), stats_shape),
            compiler_params=cparams,
            cost_estimate=pl.CostEstimate(flops=int(flops_b), transcendentals=0,
                                          bytes_accessed=bytes_b),
        )(c1_raw, scale1, shift1, w2_2d)
        scale2, shift2 = _scale_shift(stats2, count, g2p, b2p)

        # ---------------- pass C: bn2 + residual(+bn3) + relu ------------------
        # Output stays in compute_dtype: the pass is HBM-bandwidth-bound, f32
        # output would double its write traffic.
        bytes_c = int(3 * R_out * Cpo * itemsz + 4 * Cpo * 4)
        out_pad = pl.pallas_call(
            _bn_add_relu_kernel,
            grid=(T,),
            in_specs=[_act_spec(tr_out, Cpo, depth), _act_spec(tr_out, Cpo, depth),
                      const_spec((1, Cpo)), const_spec((1, Cpo)),
                      const_spec((1, Cpo)), const_spec((1, Cpo))],
            out_specs=_act_spec(tr_out, Cpo),
            out_shape=jax.ShapeDtypeStruct((R_out, Cpo), cd),
            compiler_params=cparams,
            cost_estimate=pl.CostEstimate(flops=int(3 * R_out * Cpo), transcendentals=0,
                                          bytes_accessed=bytes_c),
        )(c2_raw, residual, scale2, shift2, scale_r, shift_r)

        # NOTE: when chaining blocks, keep the padded (rows, Cpo) NHWC slab as the
        # canonical inter-block format to amortize these NCHW<->NHWC transposes;
        # they are only done here to honor the PyTorch module's NCHW interface.
        out = out_pad[:, :Cout].reshape(N, H, Wout, Cout)
        return jnp.transpose(out, (0, 3, 1, 2))              # back to NCHW


# -----------------------------------------------------------------------------
# pure-JAX reference (mirrors the PyTorch training-mode forward)
# -----------------------------------------------------------------------------
def reference_forward(x, p, downsample):
    def conv(x, w, stride, pad):
        return lax.conv_general_dilated(
            x, w, window_strides=(1, stride), padding=[(0, 0), (pad, pad)],
            dimension_numbers=("NCHW", "OIHW", "NCHW"))

    def bn(y, g, b):
        mean = jnp.mean(y, axis=(0, 2, 3), keepdims=True)
        var = jnp.mean((y - mean) ** 2, axis=(0, 2, 3), keepdims=True)
        return ((y - mean) * lax.rsqrt(var + EPS) * g.reshape(1, -1, 1, 1)
                + b.reshape(1, -1, 1, 1))

    s = 2 if downsample else 1
    h1 = jax.nn.relu(bn(conv(x, p["w1"], s, 1), p["g1"], p["b1"]))
    h2 = bn(conv(h1, p["w2"], 1, 1), p["g2"], p["b2"])
    if downsample:
        res = bn(conv(x, p["w3"], 2, 0), p["g3"], p["b3"])
    else:
        res = x
    return jax.nn.relu(h2 + res)


if __name__ == "__main__":
    key = jax.random.PRNGKey(0)
    kx, kp1, kp2 = jax.random.split(key, 3)
    x = jax.random.normal(kx, (2, 4, 16, 16), dtype=jnp.float32)

    # f32 compute path with a deliberately tiny VMEM budget so the grid has many
    # tiles -> exercises cross-tile BatchNorm statistics accumulation.
    blk = ResidualBlockPallas(4, 4, downsample=False, key=kp1,
                              compute_dtype=jnp.float32, max_tile_bytes=64 * 1024)
    y = jax.block_until_ready(blk(x))
    y_ref = reference_forward(x, blk.params, downsample=False)
    assert y.shape == (2, 4, 16, 16)
    assert jnp.allclose(y, y_ref, atol=1e-3, rtol=1e-3)

    blk_ds = ResidualBlockPallas(4, 8, downsample=True, key=kp2,
                                 compute_dtype=jnp.float32, max_tile_bytes=64 * 1024)
    y2 = jax.block_until_ready(blk_ds(x))
    y2_ref = reference_forward(x, blk_ds.params, downsample=True)
    assert y2.shape == (2, 8, 16, 8)
    assert jnp.allclose(y2, y2_ref, atol=1e-3, rtol=1e-3)

    # default (bf16 MXU operands, f32 accumulation / BN) path, default tile budget
    # (generation-aware; picks >= 2 grid tiles for megacore sharding).
    blk_bf = ResidualBlockPallas(4, 4, downsample=False, key=kp1)
    y3 = jax.block_until_ready(blk_bf(x))
    assert jnp.allclose(y3.astype(jnp.float32), y_ref, atol=5e-2, rtol=5e-2)

    blk_ds_bf = ResidualBlockPallas(4, 8, downsample=True, key=kp2)
    y4 = jax.block_until_ready(blk_ds_bf(x))
    assert jnp.allclose(y4.astype(jnp.float32), y2_ref, atol=5e-2, rtol=5e-2)

    print("KERNEL_OK")
</pallas_src>

<mosaic_0001>
module attributes {stable_mosaic.version = 11 : i64} {
  func.func @probe(%arg0: memref<8x128xf32, #tpu.memory_space<vmem>>, %arg1: memref<8x128xf32, #tpu.memory_space<vmem>>) attributes {dimension_semantics = [], scalar_prefetch = 0 : i64, scratch_operands = 0 : i64, tpu.core_type = #tpu.core_type<tc>} {
    %c0 = arith.constant 0 : index
    %c0_0 = arith.constant 0 : index
    %0 = vector.load %arg0[%c0, %c0_0] : memref<8x128xf32, #tpu.memory_space<vmem>>, vector<8x128xf32>
    %c1_i32 = arith.constant 1 : i32
    %1 = tpu.dynamic_rotate %0 by %c1_i32 dim 0 : vector<8x128xf32>, i32 -> vector<8x128xf32>
    %c0_1 = arith.constant 0 : index
    %c0_2 = arith.constant 0 : index
    %2 = vector.load %arg1[%c0_1, %c0_2] : memref<8x128xf32, #tpu.memory_space<vmem>>, vector<8x128xf32>
    tpu.vector_store %arg1[%c0_1, %c0_2], %1 {strides = array<i32>} : memref<8x128xf32, #tpu.memory_space<vmem>>, vector<8x128xf32>,
    return
  }
}

module attributes {stable_mosaic.version = 11 : i64} {
  func.func @_conv1x3_stats_kernel(%arg0: i32, %arg1: memref<16x128xf32, #tpu.memory_space<vmem>>, %arg2: memref<384x128xf32, #tpu.memory_space<vmem>>, %arg3: memref<16x128xf32, #tpu.memory_space<vmem>>, %arg4: memref<8x128xf32, #tpu.memory_space<vmem>>) attributes {dimension_semantics = [#tpu.dimension_semantics<parallel>], iteration_bounds = array<i64: 32>, scalar_prefetch = 0 : i64, scratch_operands = 0 : i64, tpu.core_type = #tpu.core_type<tc>, window_params = [{transform_indices = @transform_0, window_bounds = array<i64: 16, 128>}, {pipeline_mode = #tpu.pipeline_mode<synchronous>, transform_indices = @transform_1, window_bounds = array<i64: 384, 128>}, {transform_indices = @transform_2, window_bounds = array<i64: 16, 128>}, {transform_indices = @transform_3, window_bounds = array<i64: 8, 128>}]} {
    %c0 = arith.constant 0 : index
    %c0_0 = arith.constant 0 : index
    %0 = vector.load %arg1[%c0, %c0_0] : memref<16x128xf32, #tpu.memory_space<vmem>>, vector<16x128xf32>
    %1 = tpu.iota {dimensions = array<i32: 0>} : vector<16x1xi32>
    %c15_i32 = arith.constant 15 : i32
    %2 = vector.broadcast %c15_i32 : i32 to vector<16x1xi32>
    %3 = arith.andi %1, %2 : vector<16x1xi32>
    %c0_i32 = arith.constant 0 : i32
    %4 = vector.broadcast %c0_i32 : i32 to vector<16x1xi32>
    %5 = arith.cmpi eq, %3, %4 : vector<16x1xi32>
    %cst = arith.constant 0.000000e+00 : f32
    %6 = vector.broadcast %cst : f32 to vector<1x128xf32>
    %7 = vector.extract_strided_slice %0 {offsets = [0, 0], sizes = [15, 128], strides = [1, 1]} : vector<16x128xf32> to vector<15x128xf32>
    %8 = tpu.concatenate %6, %7 in 0 : vector<1x128xf32>, vector<15x128xf32> -> vector<16x128xf32>
    %cst_1 = arith.constant 0.000000e+00 : f32
    %9 = vector.broadcast %cst_1 : f32 to vector<16x128xf32>
    %10 = vector.shape_cast %5 : vector<16x1xi1> to vector<16x1xi1>
    %11 = vector.broadcast %10 : vector<16x1xi1> to vector<16x128xi1>
    %12 = arith.select %11, %9, %8 : vector<16x128xi1>, vector<16x128xf32>
    %c15_i32_2 = arith.constant 15 : i32
    %13 = vector.broadcast %c15_i32_2 : i32 to vector<16x1xi32>
    %14 = arith.cmpi eq, %3, %13 : vector<16x1xi32>
    %cst_3 = arith.constant 0.000000e+00 : f32
    %15 = vector.broadcast %cst_3 : f32 to vector<1x128xf32>
    %16 = vector.extract_strided_slice %0 {offsets = [1, 0], sizes = [15, 128], strides = [1, 1]} : vector<16x128xf32> to vector<15x128xf32>
    %17 = tpu.concatenate %16, %15 in 0 : vector<15x128xf32>, vector<1x128xf32> -> vector<16x128xf32>
    %cst_4 = arith.constant 0.000000e+00 : f32
    %18 = vector.broadcast %cst_4 : f32 to vector<16x128xf32>
    %19 = vector.shape_cast %14 : vector<16x1xi1> to vector<16x1xi1>
    %20 = vector.broadcast %19 : vector<16x1xi1> to vector<16x128xi1>
    %21 = arith.select %20, %18, %17 : vector<16x128xi1>, vector<16x128xf32>
    %22 = tpu.concatenate %12, %0, %21 in 1 : vector<16x128xf32>, vector<16x128xf32>, vector<16x128xf32> -> vector<16x384xf32>
    %c0_5 = arith.constant 0 : index
    %c0_6 = arith.constant 0 : index
    %23 = vector.load %arg2[%c0_5, %c0_6] : memref<384x128xf32, #tpu.memory_space<vmem>>, vector<384x128xf32>
    %cst_7 = arith.constant dense<0.000000e+00> : vector<16x128xf32>
    %24 = tpu.matmul %22, %23, %cst_7 {dimension_numbers = #tpu.dot_dimension_numbers<[1], [0], [0], [1], [0, 0, 1, 1], [], []>} : vector<16x384xf32>, vector<384x128xf32>, vector<16x128xf32> -> vector<16x128xf32>
    %c0_8 = arith.constant 0 : index
    %c0_9 = arith.constant 0 : index
    %25 = vector.load %arg3[%c0_8, %c0_9] : memref<16x128xf32, #tpu.memory_space<vmem>>, vector<16x128xf32>
    tpu.vector_store %arg3[%c0_8, %c0_9], %24 {strides = array<i32>} : memref<16x128xf32, #tpu.memory_space<vmem>>, vector<16x128xf32>,
    %cst_10 = arith.constant dense<0.000000e+00> : vector<128xf32>
    %26 = vector.multi_reduction <add>, %24, %cst_10 [0] : vector<16x128xf32> to vector<128xf32>
    %27 = vector.shape_cast %26 : vector<128xf32> to vector<1x128xf32>
    %c0_11 = arith.constant 0 : index
    %c0_12 = arith.constant 0 : index
    %28 = vector.load %arg4[%c0_11, %c0_12] : memref<8x128xf32, #tpu.memory_space<vmem>>, vector<1x128xf32>
    tpu.vector_store %arg4[%c0_11, %c0_12], %27 {strides = array<i32>} : memref<8x128xf32, #tpu.memory_space<vmem>>, vector<1x128xf32>,
    %29 = arith.mulf %24, %24 : vector<16x128xf32>
    %cst_13 = arith.constant dense<0.000000e+00> : vector<128xf32>
    %30 = vector.multi_reduction <add>, %29, %cst_13 [0] : vector<16x128xf32> to vector<128xf32>
    %31 = vector.shape_cast %30 : vector<128xf32> to vector<1x128xf32>
    %c1 = arith.constant 1 : index
    %c0_14 = arith.constant 0 : index
    %32 = vector.load %arg4[%c1, %c0_14] : memref<8x128xf32, #tpu.memory_space<vmem>>, vector<1x128xf32>
    tpu.vector_store %arg4[%c1, %c0_14], %31 {strides = array<i32>} : memref<8x128xf32, #tpu.memory_space<vmem>>, vector<1x128xf32>,
    return
  }
  func.func @transform_0(%arg0: i32) -> (i32, i32) {
    %c0_i32 = arith.constant 0 : i32
    %c0_i32_0 = arith.constant 0 : i32
    return %arg0, %c0_i32 : i32, i32
  }
  func.func @transform_1(%arg0: i32) -> (i32, i32) {
    %c0_i32 = arith.constant 0 : i32
    %c0_i32_0 = arith.constant 0 : i32
    %c0_i32_1 = arith.constant 0 : i32
    return %c0_i32, %c0_i32_0 : i32, i32
  }
  func.func @transform_2(%arg0: i32) -> (i32, i32) {
    %c0_i32 = arith.constant 0 : i32
    %c0_i32_0 = arith.constant 0 : i32
    return %arg0, %c0_i32 : i32, i32
  }
  func.func @transform_3(%arg0: i32) -> (i32, i32) {
    %c0_i32 = arith.constant 0 : i32
    %c0_i32_0 = arith.constant 0 : i32
    return %arg0, %c0_i32 : i32, i32
  }
}

</mosaic_0001>

<bundles_post_ra>
// kernel: tpu_custom_call.1
= control target key start
LH: loop header
LB: loop body
LE: loop exit
PB: predicated region body
PF: predicated region fallthrough
CT: control target
= control target key end

     0   :  { %6 = vsyncpa [#allocation3], 0  ;;  %s125_s0 = inlined_call_operand.hbm [shape: f32[8,128], index: 0, kind: input, shape index: {}]   ;;  %s126_s1 = inlined_call_operand.hbm [shape: f32[8,128], index: 1, kind: output, shape index: {}]  }
   0x1   :  { %7 = vsyncpa [#allocation4], 0  ;;  %s89_s6 = smov [#allocation2]   ;;  %s41_s10 = scalar_lea.hbm %s125_s0, 128 }
   0x2   :  { %s14_s7 = sshll.u32 %s89_s6, 4  ;;  %p42_p0 = scmp.ne.s32.totalorder %s125_s0, %s41_s10  ;;  %s15_s7 = int_to_ptr.vmem [resolvable:$true] %s14_s7 }
   0x3   :  { %p45_p1 = scmp.lt.u32.totalorder %s41_s10, %s125_s0 }
   0x5   :  { %p47_p2 = pnand %p45_p1, %p42_p0 }
   0x7   :  { %50 = shalt.err (!%p47_p2)
}
   0x8   :  { %s51_s15 = scalar_lea.vmem %s15_s7, 128  ;;  %p56_p4 = scmp.lt.s32.totalorder %s15_s7, %s15_s7 }
   0x9   :  { %p52_p3 = scmp.ne.s32.totalorder %s15_s7, %s51_s15  ;;  %p57_p5 = scmp.lt.s32.totalorder %s51_s15, %s51_s15 }
   0xb   :  { %p58_p6 = por %p57_p5, %p56_p4 }
   0xd   :  { %p59_p7 = pnand %p58_p6, %p52_p3 }
   0xf   :  { %62 = shalt.err (!%p59_p7)
}
  0x10   :  { %17 = dma.hbm_to_vmem [thread:$0]  %s125_s0, 128, %s15_s7, [#allocation3]  }
  0x11   :  { %85 = dma.done.wait [#allocation3], 128  }
  0x12   :  { %86 = vsyncadd [#allocation3], 4294967168  ;;  %s90_s18 = smov [#allocation5]   ;;  %v21_v0 = vld [vmem:[#allocation2] sm:$0xff] }
  0x13   :  { %s30_s19 = sshll.u32 %s90_s18, 4  ;;  %v22_v1 = vrot.slane %v21_v0, 7  ;;  %s31_s19 = int_to_ptr.vmem [resolvable:$true] %s30_s19 }
  0x14   :  { %s63_s20 = scalar_lea.vmem %s31_s19, 128  ;;  %p68_p9 = scmp.lt.s32.totalorder %s31_s19, %s31_s19 }
  0x15   :  { %23 = vst [vmem:[#allocation5] sm:$0xff] %v22_v1  ;;  %p64_p8 = scmp.ne.s32.totalorder %s31_s19, %s63_s20  ;;  %p69_p10 = scmp.lt.s32.totalorder %s63_s20, %s63_s20 }
  0x17   :  { %p70_p11 = por %p69_p10, %p68_p9 }
  0x19   :  { %p71_p12 = pnand %p70_p11, %p64_p8 }
  0x1b   :  { %74 = shalt.err (!%p71_p12)
}
  0x1c   :  { %s75_s23 = scalar_lea.hbm %s126_s1, 128 }
  0x1d   :  { %p76_p13 = scmp.ne.s32.totalorder %s126_s1, %s75_s23  ;;  %p79_p0 = scmp.lt.u32.totalorder %s75_s23, %s126_s1 }
  0x1f   :  { %p81_p1 = pnand %p79_p0, %p76_p13 }
  0x21   :  { %84 = shalt.err (!%p81_p1)
}
  0x22   :  { %33 = dma.vmem_to_hbm [thread:$0]  %s31_s19, 128, %s126_s1, [#allocation4]  }
  0x23   :  { %87 = dma.done.wait [#allocation4], 128  }
  0x24   :  { %88 = vsyncadd [#allocation4], 4294967168 }
  0x25   :  { %37 = vsyncpa [#allocation3], 1 }
  0x26   :  { %38 = vsyncpa [#allocation4], 1 }

// kernel: tpu_custom_call.1
= control target key start
LH: loop header
LB: loop body
LE: loop exit
PB: predicated region body
PF: predicated region fallthrough
CT: control target
= control target key end

     0   :  { %9 = vsyncpa [#allocation3], 0  ;;  %s1308_s0 = inlined_call_operand.hbm [shape: f32[512,128], index: 0, kind: input, shape index: {}]   ;;  %s1309_s1 = inlined_call_operand.hbm [shape: f32[384,128], index: 1, kind: input, shape index: {}]   ;;  %s1310_s2 = inlined_call_operand.hbm [shape: f32[512,128], index: 2, kind: output, shape index: {0}]   ;;  %s1311_s3 = inlined_call_operand.hbm [shape: f32[256,128], index: 3, kind: output, shape index: {1}]  }
   0x1   :  { %11 = vsyncpa [#allocation3 + $0x1], 0 }
   0x2   :  { %12 = vsyncpa [#allocation6], 0 }
   0x3   :  { %13 = vsyncpa [#allocation4], 0 }
   0x4   :  { %15 = vsyncpa [#allocation4 + $0x1], 0 }
   0x5   :  { %16 = vsyncpa [#allocation9], 0 }
   0x6   :  { %18 = vsyncpa [#allocation9 + $0x1], 0  ;;  %s1059_s12 = smov 0   ;;  %s1061_s13 = smov 0  }
   0x7   :  { %s1063_s14 = smov 0   ;;  %s1065_s15 = smov 0  }
   0x8 LB: > { %s1080_s16 = sadd.s32 4294967295, %s1029_s15   ;;  %s621_s17 = sadd.s32 4294967294, %s1029_s15   ;;  %s1029_s15 = sphi %s1065_s15, %s1330_s15   ;;  %s1025_s14 = sphi %s1063_s14, %s1329_s14   ;;  %s1021_s13 = sphi %s1061_s13, %s1328_s13   ;;  %s1017_s12 = sphi %s1059_s12, %s1327_s12  }
   0x9   : > { %p44_p0 = scmp.ne.s32.totalorder %s1021_s13, %s1017_s12  ;;  %p1312_p1 = scmp.eq.s32.totalorder %s1080_s16, 0 }
   0xa   : > { %p95_p3 = scmp.eq.s32.totalorder %s621_s17, 31  ;;  %p622_p5 = scmp.ge.s32.totalorder %s1029_s15, 1 }
   0xb   : > { %p1089_p4 = por %p1312_p1, %p44_p0  ;;  %p128_p7 = scmp.lt.s32.totalorder %s1029_s15, 33 }
   0xc   : > { %p1094_p6 = por %p95_p3, %p44_p0  ;;  %s1031_s21 = smov [#allocation5]  }
   0xd   : > { %s1315_s18 = scalar_select %p1089_p4, 1, 0 }
   0xe   : > { %s1316_s19 = scalar_select %p1094_p6, 1, 0 }
   0xf   : > { %p1099_p8 = pnand %p622_p5, %p128_p7  ;;  %s140_s22 = sshll.u32 %s1031_s21, 4  ;;  %s141_s22 = int_to_ptr.vmem [resolvable:$true] %s140_s22 }
  0x10   : > { %s1112_s24 = sadd.s32 1, %s1029_s15   ;;  %s31_s25 = sadd.s32 1, %s1025_s14 }
  0x11   : > { %s1317_s20 = scalar_select %p1099_p8, 1, 0 }
  0x12   : > { %p813_p9 = pneg %p1099_p8  ;;  %s28_s26 = ssub.s32 %s1029_s15, %s1112_s24 }
  0x13   : > { %s869_s29 = scalar_lea.hbm %s1309_s1, 6144 }
  0x14   : > { %p1107_p10 = pnand %p813_p9, %p1312_p1  ;;  %p870_p11 = scmp.ne.s32.totalorder %s1309_s1, %s869_s29 }
  0x15   : > { %p876_p3 = scmp.lt.u32.totalorder %s869_s29, %s1309_s1 }
  0x16   : > { %p871_p12 = pneg %p1107_p10 }
  0x18   : > { %p872_p13 = pnand %p871_p12, %p870_p11 }
  0x1a   : > { %p873_p0 = pneg %p872_p13 }
  0x1c   : > { %p878_p5 = pnand %p876_p3, %p873_p0 }
  0x1e   : > { %881 = shalt.err (!%p878_p5)
}
  0x1f   : > { %s882_s7 = scalar_lea.vmem %s141_s22, 6144  ;;  %p890_p2 = scmp.lt.s32.totalorder %s141_s22, %s141_s22 }
  0x20   : > { %p883_p7 = scmp.ne.s32.totalorder %s141_s22, %s882_s7  ;;  %p891_p6 = scmp.lt.s32.totalorder %s882_s7, %s882_s7 }
  0x22   : > { %p885_p9 = pnand %p883_p7, %p871_p12  ;;  %p892_p4 = por %p891_p6, %p890_p2 }
  0x24   : > { %p886_p1 = pneg %p885_p9 }
  0x26   : > { %p893_p8 = pnand %p892_p4, %p886_p1 }
  0x28   : > { %896 = shalt.err (!%p893_p8)
}
  0x29   : > { %s1032_s8 = smov 128   ;;  %s1033_s9 = smov 8  }
  0x2a   : > { %816 = dma.hbm_to_vmem [thread:$0]  (!%p1107_p10), %s1309_s1, 6144, %s141_s22, [#allocation6], %s1032_s8, %s1032_s8, %s1033_s9  }
  0x2b   : > { %p29_p1 = scmp.eq.s32.totalorder %s28_s26, 0  ;;  %p38_p2 = scmp.ne.s32.totalorder %s1025_s14, %s1021_s13 }
  0x2c   : > { %p39_p4 = scmp.eq.s32.totalorder %s1029_s15, 0  ;;  %p829_p6 = scmp.lt.s32.totalorder %s1029_s15, 32 }
  0x2d   : > { %s1141_s17 = scalar_select %p29_p1, %s1025_s14, %s31_s25  }
  0x2e   : > { %p40_p8 = por %p39_p4, %p38_p2  ;;  %p1319_p11 = scmp.eq.s32.totalorder %s1080_s16, 31 }
  0x2f   : > { %s154_s23 = sand.u32 1, %s1025_s14   ;;  %s644_s27 = sshll.u32 %s1029_s15, 8 }
  0x30   : > { %p1145_p12 = por %p1319_p11, %p38_p2  ;;  %s625_s28 = sshll.u32 %s154_s23, 4 }
  0x31   : > { %s1154_s4 = scalar_lea.hbm %s1308_s0, %s644_s27  ;;  %s158_s22 = scalar_lea.vmem [#allocation2], %s625_s28 }
  0x32   : > { %s165_s25 = sshll.u32 %s158_s22, 4  ;;  %p1156_p10 = pnand %p829_p6, %p40_p8  ;;  %s1160_s25 = int_to_ptr.vmem [resolvable:$true] %s165_s25 }
  0x33   : > { %s1162_s5 = scalar_lea.sflag [#allocation3], %s154_s23  ;;  %s897_s6 = scalar_lea.hbm %s1154_s4, 256 }
  0x34   : > { %p898_p13 = scmp.ne.s32.totalorder %s1154_s4, %s897_s6  ;;  %p899_p0 = pneg %p1156_p10 }
  0x35   : > { %s902_s11 = scalar_lea.hbm %s1308_s0, 8192  ;;  %p903_p7 = scmp.lt.u32.totalorder %s1154_s4, %s1308_s0 }
  0x36   : > { %p900_p3 = pnand %p899_p0, %p898_p13  ;;  %p904_p9 = scmp.lt.u32.totalorder %s902_s11, %s897_s6 }
  0x37   : > { %p906_p2 = scmp.lt.u32.totalorder %s897_s6, %s1154_s4 }
  0x38   : > { %p901_p5 = pneg %p900_p3  ;;  %p905_p1 = por %p904_p9, %p903_p7 }
  0x3a   : > { %p907_p4 = por %p906_p2, %p905_p1 }
  0x3c   : > { %p908_p6 = pnand %p907_p4, %p901_p5 }
  0x3e   : > { %911 = shalt.err (!%p908_p6)
}
  0x3f   : > { %s912_s23 = scalar_lea.vmem %s1160_s25, 256  ;;  %s1034_s29 = smov [#allocation2]  }
  0x40   : > { %p913_p8 = scmp.ne.s32.totalorder %s1160_s25, %s912_s23  ;;  %s917_s30 = sshll.u32 %s1034_s29, 4  ;;  %s918_s30 = int_to_ptr.vmem [resolvable:$false] %s917_s30 }
  0x41   : > { %s919_s22 = scalar_lea.vmem %s918_s30, 512  ;;  %p920_p3 = scmp.lt.s32.totalorder %s1160_s25, %s918_s30 }
  0x42   : > { %p915_p11 = pnand %p913_p8, %p899_p0  ;;  %p921_p7 = scmp.lt.s32.totalorder %s919_s22, %s912_s23 }
  0x44   : > { %p916_p13 = pneg %p915_p11  ;;  %p922_p9 = por %p921_p7, %p920_p3 }
  0x46   : > { %p923_p1 = pnand %p922_p9, %p916_p13 }
  0x48   : > { %926 = shalt.err (!%p923_p1)
}
  0x49   : > { %820 = dma.hbm_to_vmem [thread:$0]  (!%p1156_p10), %s1154_s4, 256, %s1160_s25, %s1162_s5, %s1032_s8, %s1032_s8, %s1033_s9  }
  0x4a   : > { %p1322_p0 = scmp.ne.s32.totalorder %s1317_s20, 0 }
  0x4b   : > { %s1196_s6 = sand.u32 (!%p1322_p0), 1, %s1021_s13   ;;  %p1323_p5 = scmp.ne.s32.totalorder (!%p1322_p0), %s1315_s18, 0 }
  0x4c   : > { %177 = sbr.rel (%p1322_p0) target bundleno = 384 (0x180), region = 28  ;;  %s629_s7 = sshll.u32 (!%p1322_p0), %s1196_s6, 4 }
  0x4d   : > { %s180_s10 = scalar_lea.sflag (!%p1322_p0), [#allocation3], %s1196_s6  ;;  %s1202_s26 = scalar_lea.vmem (!%p1322_p0), [#allocation2], %s629_s7 }
  0x53   : > { %1000 = dma.done.wait (%p1323_p5), %s180_s10, 256  }
  0x54   : > { %1002 = vsyncadd (%p1323_p5), %s180_s10, 4294967040  ;;  %p1324_p10 = scmp.eq.s32.totalorder %s1080_s16, 0 }
  0x56   : > { %1004 = dma.done.wait (%p1324_p10), [#allocation6], 6144   ;;  %p1325_p2 = pmov %p1324_p10 }
  0x57   : > { %v272_v0 = vld [vmem:[#allocation5 + $0x80] sm:$0xff]  ;;  %v273_v1 = vld [vmem:[#allocation5 + $0x88] sm:$0xff]  ;;  %v274_v9 = vld [vmem:[#allocation5 + $0x90] sm:$0xff]  ;;  %vm243_vm0 = vcmask 1046528   ;;  %v219_v55 = vlaneseq  ;;  %vm228_vm1 = vcmask 1040384   ;;  %s207_s18 = scalar_lea.vmem [#allocation7], %s629_s7 }
  0x58   : > { %1006 = vsyncadd (%p1325_p2), [#allocation6], 4294961152  ;;  %v256_v2 = vld [vmem:[#allocation5] sm:$0xff]  ;;  %v739_v3 = vpack.c.bf16 %v273_v1, %v272_v0  ;;  %v257_v4 = vld [vmem:[#allocation5 + $0x8] sm:$0xff]  ;;  %s493_s20 = sshll.u32 %s207_s18, 4  ;;  %s645_s8 = sshll.u32 %s1080_s16, 8  ;;  %s1229_s20 = int_to_ptr.vmem [resolvable:$true] %s493_s20 }
  0x59   : > { %v288_v5 = vld [vmem:[#allocation5 + $0x100] sm:$0xff]  ;;  %v289_v6 = vld [vmem:[#allocation5 + $0x108] sm:$0xff]  ;;  %v741_v7 = vpack.c.bf16 %v257_v4, %v256_v2  ;;  %v275_v10 = vld [vmem:[#allocation5 + $0x98] sm:$0xff]  ;;  %s1234_s25 = scalar_lea.hbm %s1310_s2, %s645_s8  ;;  %s475_s5 = scalar_lea.sflag [#allocation4], %s1196_s6 }
  0x5a   : > { %v771_v8 = vpack.c.bf16 %v289_v6, %v288_v5  ;;  %v258_v11 = vld [vmem:[#allocation5 + $0x10] sm:$0xff]  ;;  %740 = vmatprep.subr.bf16.mxu0 %v739_v3  ;;  %v743_v12 = vpack.c.bf16 %v275_v10, %v274_v9  ;;  %v259_v13 = vld [vmem:[#allocation5 + $0x18] sm:$0xff]  ;;  %v276_v18 = vld [vmem:[#allocation5 + $0xa0] sm:$0xff]  ;;  %v220_v3 = vshrl.u32 %v219_v55, 7  ;;  %s927_s11 = scalar_lea.vmem %s1229_s20, 256  ;;  %s1035_s27 = smov [#allocation7]  }
  0x5b   : > { %v290_v14 = vld [vmem:[#allocation5 + $0x110] sm:$0xff]  ;;  %v291_v15 = vld [vmem:[#allocation5 + $0x118] sm:$0xff]  ;;  %742 = vmatpush3.bf16.msra.mxu0 %v741_v7  ;;  %v745_v16 = vpack.c.bf16 %v259_v13, %v258_v11  ;;  %v277_v19 = vld [vmem:[#allocation5 + $0xa8] sm:$0xff]  ;;  %p928_p4 = scmp.ne.s32.totalorder %s1229_s20, %s927_s11  ;;  %s931_s28 = sshll.u32 %s1035_s27, 4  ;;  %s932_s28 = int_to_ptr.vmem [resolvable:$false] %s931_s28 }
  0x5c   : > { %772 = vmatprep.subr.bf16.mxu1 %v771_v8  ;;  %v775_v17 = vpack.c.bf16 %v291_v15, %v290_v14  ;;  %v260_v20 = vld [vmem:[#allocation5 + $0x20] sm:$0xff]  ;;  %744 = vmatprep.subr.bf16.mxu0 %v743_v12  ;;  %v747_v21 = vpack.c.bf16 %v277_v19, %v276_v18  ;;  %v261_v22 = vld [vmem:[#allocation5 + $0x28] sm:$0xff]  ;;  %v278_v26 = vld [vmem:[#allocation5 + $0xb0] sm:$0xff]  ;;  %v221_v13 = vadd.s32 8, %v220_v3  ;;  %s933_s23 = scalar_lea.vmem %s932_s28, 512  ;;  %p934_p11 = scmp.lt.s32.totalorder %s1229_s20, %s932_s28 }
  0x5d   : > { %774 = vmatpush3.bf16.msra.mxu1 %v771_v8  ;;  %v292_v23 = vld [vmem:[#allocation5 + $0x120] sm:$0xff]  ;;  %v293_v24 = vld [vmem:[#allocation5 + $0x128] sm:$0xff]  ;;  %v279_v27 = vld [vmem:[#allocation5 + $0xb8] sm:$0xff]  ;;  %v749_v30 = vpack.c.bf16 %v261_v22, %v260_v20  ;;  %p929_p6 = pnand %p928_p4, %p1145_p12  ;;  %p935_p13 = scmp.lt.s32.totalorder %s933_s23, %s927_s11 }
  0x5e   : > { %776 = vmatprep.subr.bf16.mxu1 %v775_v17  ;;  %v779_v25 = vpack.c.bf16 %v293_v24, %v292_v23  ;;  %v294_v28 = vld [vmem:[#allocation5 + $0x130] sm:$0xff]  ;;  %v295_v29 = vld [vmem:[#allocation5 + $0x138] sm:$0xff]  ;;  %v751_v31 = vpack.c.bf16 %v279_v27, %v278_v26  ;;  %v280_v35 = vld [vmem:[#allocation5 + $0xc0] sm:$0xff]  ;;  %v223_v18 = vand.u32 15, %v221_v13 }
  0x5f   : > { %746 = vmatpush3.bf16.msra.mxu0 %v745_v16  ;;  %v262_v32 = vld [vmem:[#allocation5 + $0x30] sm:$0xff]  ;;  %v263_v33 = vld [vmem:[#allocation5 + $0x38] sm:$0xff]  ;;  %v783_v34 = vpack.c.bf16 %v295_v29, %v294_v28  ;;  %v281_v36 = vld [vmem:[#allocation5 + $0xc8] sm:$0xff]  ;;  %p930_p8 = pneg %p929_p6  ;;  %p936_p3 = por %p935_p13, %p934_p11 }
  0x60   : > { %748 = vmatprep.subr.bf16.mxu0 %v747_v21  ;;  %v296_v37 = vld [vmem:[#allocation5 + $0x140] sm:$0xff]  ;;  %v297_v38 = vld [vmem:[#allocation5 + $0x148] sm:$0xff]  ;;  %v753_v39 = vpack.c.bf16 %v263_v33, %v262_v32  ;;  %v755_v40 = vpack.c.bf16 %v281_v36, %v280_v35  ;;  %v282_v44 = vld [vmem:[#allocation5 + $0xd0] sm:$0xff]  ;;  %vm647_vm3 = vcmp.ne.s32.totalorder %v223_v18, 15 }
  0x61   : > { %778 = vmatpush3.bf16.msra.mxu1 %v775_v17  ;;  %v264_v41 = vld [vmem:[#allocation5 + $0x40] sm:$0xff]  ;;  %v265_v42 = vld [vmem:[#allocation5 + $0x48] sm:$0xff]  ;;  %v787_v43 = vpack.c.bf16 %v297_v38, %v296_v37  ;;  %v283_v45 = vld [vmem:[#allocation5 + $0xd8] sm:$0xff]  ;;  %v222_v17 = vand.u32 15, %v220_v3  ;;  %p937_p7 = pnand %p936_p3, %p930_p8 }
  0x62   : > { %780 = vmatprep.subr.bf16.mxu1 %v779_v25  ;;  %v298_v46 = vld [vmem:[#allocation5 + $0x150] sm:$0xff]  ;;  %v299_v47 = vld [vmem:[#allocation5 + $0x158] sm:$0xff]  ;;  %v757_v48 = vpack.c.bf16 %v265_v42, %v264_v41  ;;  %v759_v51 = vpack.c.bf16 %v283_v45, %v282_v44  ;;  %v284_v58 = vld [vmem:[#allocation5 + $0xe0] sm:$0xff] }
  0x63   : > { %750 = vmatpush3.bf16.msra.mxu0 %v749_v30  ;;  %v1213_v49 = vld [vmem:[%s1202_s26] sm:$0xff]  ;;  %v1216_v50 = vld [vmem:[%s1202_s26 + $0x8] sm:$0xff]  ;;  %v791_v57 = vpack.c.bf16 %v299_v47, %v298_v46  ;;  %vm646_vm2 = vcmp.ne.s32.totalorder %v222_v17, 0 }
  0x64   : > { %752 = vmatprep.subr.bf16.mxu0 %v751_v31  ;;  %v266_v52 = vld [vmem:[#allocation5 + $0x50] sm:$0xff]  ;;  %v267_v53 = vld [vmem:[#allocation5 + $0x58] sm:$0xff]  ;;  %v244_v54 = vrot.slane %v1213_v49, 1  ;;  %v245_v56 = vrot.slane %v1216_v50, 1  ;;  %v285_v59 = vld [vmem:[#allocation5 + $0xe8] sm:$0xff]  ;;  %368 = vmatprep.mubr.f32.mxu0 %v1213_v49  ;;  %v229_v16 = vrot.slane %v1213_v49, 7 }
  0x65   : > { %782 = vmatpush3.bf16.msra.mxu1 %v779_v25  ;;  %v300_v60 = vld [vmem:[#allocation5 + $0x160] sm:$0xff]  ;;  %v301_v61 = vld [vmem:[#allocation5 + $0x168] sm:$0xff]  ;;  %v761_v63 = vpack.c.bf16 %v267_v53, %v266_v52  ;;  %v763_v0 = vpack.c.bf16 %v285_v59, %v284_v58  ;;  %v286_v5 = vld [vmem:[#allocation5 + $0xf0] sm:$0xff]  ;;  %v230_v20 = vrot.slane %v1216_v50, 7 }
  0x66   : > { %784 = vmatprep.subr.bf16.mxu1 %v783_v34  ;;  %v246_v62 = vsel %vm243_vm0, %v244_v54, %v245_v56  ;;  %v268_v1 = vld [vmem:[#allocation5 + $0x60] sm:$0xff]  ;;  %v269_v2 = vld [vmem:[#allocation5 + $0x68] sm:$0xff]  ;;  %v795_v4 = vpack.c.bf16 %v301_v61, %v300_v60  ;;  %v287_v6 = vld [vmem:[#allocation5 + $0xf8] sm:$0xff]  ;;  %v234_v19 = vsel %vm228_vm1, 0.0, %v229_v16  ;;  %v249_v21 = vsel %vm243_vm0, %v245_v56, 0.0 }
  0x67   : > { %754 = vmatpush3.bf16.msra.mxu0 %v753_v39  ;;  %736 = vmatprep.mubr.f32.mxu1 %v246_v62  ;;  %v302_v7 = vld [vmem:[#allocation5 + $0x170] sm:$0xff]  ;;  %v303_v8 = vld [vmem:[#allocation5 + $0x178] sm:$0xff]  ;;  %v765_v9 = vpack.c.bf16 %v269_v2, %v268_v1  ;;  %v767_v10 = vpack.c.bf16 %v287_v6, %v286_v5  ;;  %v231_v22 = vsel %vm228_vm1, %v229_v16, %v230_v20 }
  0x68   : > { %756 = vmatprep.subr.bf16.mxu0 %v755_v40  ;;  %v270_v11 = vld [vmem:[#allocation5 + $0x70] sm:$0xff]  ;;  %v271_v12 = vld [vmem:[#allocation5 + $0x78] sm:$0xff]  ;;  %v799_v14 = vpack.c.bf16 %v303_v8, %v302_v7 }
  0x69   : > { %786 = vmatpush3.bf16.msra.mxu1 %v783_v34  ;;  %v769_v15 = vpack.c.bf16 %v271_v12, %v270_v11 }
  0x6a   : > { %788 = vmatprep.subr.bf16.mxu1 %v787_v43 }
  0x6b   : > { %758 = vmatpush3.bf16.msra.mxu0 %v757_v48 }
  0x6c   : > { %760 = vmatprep.subr.bf16.mxu0 %v759_v51 }
  0x6d   : > { %790 = vmatpush3.bf16.msra.mxu1 %v787_v43 }
  0x6e   : > { %792 = vmatprep.subr.bf16.mxu1 %v791_v57 }
  0x6f   : > { %762 = vmatpush3.bf16.msra.mxu0 %v761_v63 }
  0x70   : > { %764 = vmatprep.subr.bf16.mxu0 %v763_v0 }
  0x71   : > { %794 = vmatpush3.bf16.msra.mxu1 %v791_v57 }
  0x72   : > { %796 = vmatprep.subr.bf16.mxu1 %v795_v4 }
  0x73   : > { %766 = vmatpush3.bf16.msra.mxu0 %v765_v9 }
  0x74   : > { %768 = vmatprep.subr.bf16.mxu0 %v767_v10 }
  0x75   : > { %798 = vmatpush3.bf16.msra.mxu1 %v795_v4 }
  0x76   : > { %800 = vmatprep.subr.bf16.mxu1 %v799_v14 }
  0x77   : > { %770 = vmatpush3.bf16.msra.mxu0 %v769_v15 }
  0x79   : > { %802 = vmatpush3.bf16.msra.mxu1 %v799_v14 }
  0x7a   : > { %634 = vmatmul.mubr.msk.f32.vlgmr.msra.gmra.mrb[0].mxu0 %vm646_vm2, %v234_v19 }
  0x7b   : > { %373 = vmatprep.mubr.f32.mxu0 %v1216_v50 }
  0x7c   : > { %737 = vmatmul.mubr.msk.f32.vlgmr.msra.gmra.mrb[0].mxu1 %vm647_vm3, %v249_v21 }
  0x7e   : > { %374 = vmatmul.mubr.f32.gmra.mrb[2].mxu0 %v231_v22 }
 0x14d   : > { %v680_v23 = vpop.f32.mrb[0].mxu0 }
 0x14e   : > { %v681_v24 = vpop.f32.mrb[1].mxu0 }
 0x14f   : > { %v738_v25 = vpop.f32.mrb[0].mxu1  ;;  %v682_v26 = vadd.f32 %v681_v24, %v680_v23 }
 0x150   : > { %v445_v27 = vpop.f32.mrb[1].mxu1 }
 0x151   : > { %v446_v28 = vadd.f32 %v682_v26, %v445_v27  ;;  %v683_v29 = vpop.f32.mrb[2].mxu0 }
 0x152   : > { %v684_v30 = vpop.f32.mrb[3].mxu0 }
 0x153   : > { %454 = vst [vmem:[%s207_s18] sm:$0xff] %v446_v28  ;;  %v685_v31 = vadd.f32 %v684_v30, %v683_v29  ;;  %v464_v33 = vmul.f32 %v446_v28, %v446_v28 }
 0x155   : > { %v451_v32 = vadd.f32 %v738_v25, %v685_v31 }
 0x157   : > { %455 = vst [vmem:[%s207_s18 + $0x8] sm:$0xff] %v451_v32  ;;  %v456_v34 = vadd.f32 %v451_v32, %v446_v28  ;;  %v465_v35 = vmul.f32 %v451_v32, %v451_v32 }
 0x158   : > { %940 = shalt.err (!%p937_p7)
}
 0x159   : > { %s941_s29 = scalar_lea.hbm %s1234_s25, 256  ;;  %s945_s7 = scalar_lea.hbm %s1310_s2, 8192 }
 0x15a   : > { %p942_p9 = scmp.ne.s32.totalorder %s1234_s25, %s941_s29  ;;  %p946_p5 = scmp.lt.u32.totalorder %s1234_s25, %s1310_s2 }
 0x15b   : > { %p947_p10 = scmp.lt.u32.totalorder %s945_s7, %s941_s29  ;;  %p949_p4 = scmp.lt.u32.totalorder %s941_s29, %s1234_s25 }
 0x15c   : > { %p943_p1 = pnand %p942_p9, %p1145_p12 }
 0x15d   : > { %p948_p2 = por %p947_p10, %p946_p5 }
 0x15e   : > { %p944_p0 = pneg %p943_p1 }
 0x15f   : > { %p950_p6 = por %p949_p4, %p948_p2 }
 0x161   : > { %p951_p8 = pnand %p950_p6, %p944_p0 }
 0x163   : > { %954 = shalt.err (!%p951_p8)
}
 0x164   : > { %s1036_s18 = smov 128   ;;  %s1037_s8 = smov 8   ;;  %v457_v36 = vrot.slane %v456_v34, 4  ;;  %v466_v37 = vadd.f32 %v465_v35, %v464_v33 }
 0x165   : > { %809 = dma.vmem_to_hbm [thread:$0]  (%p1145_p12), %s1229_s20, 256, %s1234_s25, %s475_s5, %s1036_s18, %s1036_s18, %s1037_s8  }
 0x166   : > { %v458_v38 = vadd.f32 %v457_v36, %v456_v34  ;;  %v467_v39 = vrot.slane %v466_v37, 4  ;;  %s632_s9 = sshll.u32 %s1196_s6, 3  ;;  %s641_s4 = sshll.u32 %s1080_s16, 7 }
 0x167   : > { %s214_s11 = scalar_lea.vmem [#allocation8], %s632_s9  ;;  %s1265_s5 = scalar_lea.hbm %s1311_s3, %s641_s4 }
 0x168   : > { %v459_v40 = vrot.slane %v458_v38, 2  ;;  %v468_v41 = vadd.f32 %v467_v39, %v466_v37  ;;  %s509_s27 = sshll.u32 %s214_s11, 4  ;;  %s480_s28 = scalar_lea.sflag [#allocation9], %s1196_s6  ;;  %s1267_s27 = int_to_ptr.vmem [resolvable:$true] %s509_s27 }
 0x169   : > { %s955_s23 = scalar_lea.vmem %s1267_s27, 128  ;;  %s1038_s16 = smov [#allocation8]  }
 0x16a   : > { %v460_v42 = vadd.f32 %v459_v40, %v458_v38  ;;  %v469_v43 = vrot.slane %v468_v41, 2  ;;  %p956_p11 = scmp.ne.s32.totalorder %s1267_s27, %s955_s23  ;;  %s959_s29 = sshll.u32 %s1038_s16, 4  ;;  %s960_s29 = int_to_ptr.vmem [resolvable:$false] %s959_s29 }
 0x16b   : > { %s961_s30 = scalar_lea.vmem %s960_s29, 256  ;;  %p962_p7 = scmp.lt.s32.totalorder %s1267_s27, %s960_s29 }
 0x16c   : > { %v461_v44 = vrot.slane %v460_v42, 1  ;;  %v470_v45 = vadd.f32 %v469_v43, %v468_v41  ;;  %p957_p13 = pnand %p956_p11, %p1145_p12  ;;  %p963_p9 = scmp.lt.s32.totalorder %s961_s30, %s955_s23 }
 0x16e   : > { %v462_v46 = vadd.f32 %v461_v44, %v460_v42  ;;  %v471_v47 = vrot.slane %v470_v45, 1  ;;  %p958_p3 = pneg %p957_p13  ;;  %p964_p1 = por %p963_p9, %p962_p7 }
 0x170   : > { %463 = vst [vmem:[%s214_s11] sm:$0x1] %v462_v46  ;;  %v472_v48 = vadd.f32 %v471_v47, %v470_v45  ;;  %p965_p0 = pnand %p964_p1, %p958_p3 }
 0x172   : > { %473 = vst [vmem:[%s214_s11 + $0x1] sm:$0x1] %v472_v48 }
 0x173   : > { %968 = shalt.err (!%p965_p0)
}
 0x174   : > { %s969_s6 = scalar_lea.hbm %s1265_s5, 128  ;;  %s973_s10 = scalar_lea.hbm %s1311_s3, 4096 }
 0x175   : > { %p970_p5 = scmp.ne.s32.totalorder %s1265_s5, %s969_s6  ;;  %p974_p4 = scmp.lt.u32.totalorder %s1265_s5, %s1311_s3 }
 0x176   : > { %p975_p6 = scmp.lt.u32.totalorder %s973_s10, %s969_s6  ;;  %p977_p11 = scmp.lt.u32.totalorder %s969_s6, %s1265_s5 }
 0x177   : > { %p971_p10 = pnand %p970_p5, %p1145_p12 }
 0x178   : > { %p976_p8 = por %p975_p6, %p974_p4 }
 0x179   : > { %p972_p2 = pneg %p971_p10 }
 0x17a   : > { %p978_p13 = por %p977_p11, %p976_p8 }
 0x17c   : > { %p979_p3 = pnand %p978_p13, %p972_p2 }
 0x17e   : > { %982 = shalt.err (!%p979_p3)
}
 0x17f   : > { %810 = dma.vmem_to_hbm [thread:$0]  (%p1145_p12), %s1267_s27, 128, %s1265_s5, %s480_s28  }
 0x180 PF: > { %p831_p7 = scmp.ge.s32.totalorder %s1029_s15, 2  ;;  %s521_s8 = sand.u32 1, %s1017_s12  }
 0x181   : > { %p1326_p9 = scmp.ne.s32.totalorder %s1316_s19, 0  ;;  %s522_s9 = scalar_lea.sflag [#allocation4], %s521_s8 }
 0x183   : > { %p822_p1 = pnand %p831_p7, %p1326_p9 }
 0x185   : > { %1008 = dma.done.wait (!%p822_p1), %s522_s9, 256  }
 0x186   : > { %1010 = vsyncadd (!%p822_p1), %s522_s9, 4294967040  ;;  %s531_s4 = scalar_lea.sflag [#allocation9], %s521_s8 }
 0x187   : > { %1012 = dma.done.wait (!%p822_p1), %s531_s4, 128  }
 0x188   : > { %1014 = vsyncadd (!%p822_p1), %s531_s4, 4294967168  ;;  %p21_p12 = scmp.ge.s32.totalorder %s1112_s24, 34   ;;  %s1327_s12 = smov %s1021_s13 }
 0x189   : > { %s1328_s13 = smov %s1025_s14  ;;  %s1329_s14 = smov %s1141_s17 }
 0x18a   : > { %s1330_s15 = smov %s1112_s24  ;;  %23 = sbr.rel (!%p21_p12) target bundleno = 8 (0x8), region = 94 }
 0x191   :  { %536 = vsyncpa [#allocation3], 1 }
 0x192   :  { %538 = vsyncpa [#allocation3 + $0x1], 1 }
 0x193   :  { %539 = vsyncpa [#allocation6], 1 }
 0x194   :  { %540 = vsyncpa [#allocation4], 1 }
 0x195   :  { %542 = vsyncpa [#allocation4 + $0x1], 1 }
 0x196   :  { %543 = vsyncpa [#allocation9], 1 }
 0x197   :  { %545 = vsyncpa [#allocation9 + $0x1], 1 }

</bundles_post_ra>
